<compile_context>
chip_gen: v7x
topology: tpu7x:2x2x1
jax: 0.10.0
libtpu: 0.0.40
codegen_flags: <defaults>
</compile_context>

<pallas_src>
import functools

import numpy as np
import jax
import jax.numpy as jnp
from jax import lax
from jax.experimental import pallas as pl
from jax.experimental.pallas import tpu as pltpu

LANE = 128


# --------------------------------------------------------------------------- helpers

def _round_up(x, m):
    return ((x + m - 1) // m) * m


def _largest_divisor(n, cap):
    d = min(n, cap)
    while n % d:
        d -= 1
    return max(d, 1)


def _pick_row_tile(H, cap):
    """Largest divisor of H <= cap; prefer >=2 row tiles when H allows (v7x megacore)."""
    t = _largest_divisor(H, cap)
    if t == H and H >= 16:
        t = _largest_divisor(H, H // 2)
    return t


def _vmem_limit_bytes():
    # Scoped-VMEM budget derived per generation: half of physical, capped at 64 MiB
    # (v5e/v6e: 128 MiB phys -> 64 MiB, v7x: 64 MiB phys -> 32 MiB).
    try:
        return int(min(pltpu.get_tpu_info().vmem_capacity_bytes // 2, 64 * 1024 * 1024))
    except Exception:
        return None


_VMEM_LIMIT = _vmem_limit_bytes()


def _cparams(dims):
    kw = dict(dimension_semantics=dims)
    if _VMEM_LIMIT:
        kw["vmem_limit_bytes"] = _VMEM_LIMIT
    return pltpu.CompilerParams(**kw)


# --------------------------------------------------------------------------- tiled matmul + bias + relu (coarsest lateral only)

def _mm_bias_relu_kernel(x_ref, w_ref, b_ref, o_ref):
    y = jnp.dot(x_ref[...], w_ref[...], preferred_element_type=jnp.float32)
    o_ref[...] = jnp.maximum(y + b_ref[...], 0.0).astype(o_ref.dtype)


def matmul_bias_relu(x, w, b, *, tile_cap=1024):
    """relu(x @ w + b).  x:(M,K) w:(K,Cout) b:(Cout,) — row-tiled, cdiv grid (masked tail).

    tile_cap is the per-generation row-tile budget: v5e/v6e can take 2-4k rows against
    128 MiB VMEM, v7x ~1-2k against 64 MiB (re-sweep after a bf16 switch)."""
    M, K = x.shape
    Cout = w.shape[1]
    if M <= 8:
        tm = M
    else:
        tm = min(tile_cap, _round_up(pl.cdiv(M, 2), 8))    # >=2 grid steps (v7x megacore)
        tm = min(tm, _round_up(M, 8))
    grid = (pl.cdiv(M, tm),)
    cost = pl.CostEstimate(flops=2 * M * K * Cout, transcendentals=0,
                           bytes_accessed=4 * (M * K + K * Cout + M * Cout + Cout))
    return pl.pallas_call(
        _mm_bias_relu_kernel,
        out_shape=jax.ShapeDtypeStruct((M, Cout), jnp.float32),
        grid=grid,
        in_specs=[pl.BlockSpec((tm, K), lambda i: (i, 0)),
                  pl.BlockSpec((K, Cout), lambda i: (0, 0)),
                  pl.BlockSpec((1, Cout), lambda i: (0, 0))],
        out_specs=pl.BlockSpec((tm, Cout), lambda i: (i, 0)),
        compiler_params=_cparams(("parallel",)),
        cost_estimate=cost,
    )(x, w, b.reshape(1, Cout))


# --------------------------------------------------------------------------- 3x3 conv (+BN+ReLU), in-kernel halo, no im2col

def _conv3x3_kernel(xp_ref, w_ref, b_ref, o_ref):
    # xp_ref: (H+2, W+2, C) zero-haloed full-height rows for this batch element
    #         (its block index is constant across the row-tile axis -> DMA'd once per n).
    # w_ref : (9, C, oc) folded conv*BN weights, resident in VMEM.
    # o_ref : (T, W, oc) output row tile.
    T, W, oc = o_ref.shape
    C = xp_ref.shape[-1]
    r0 = pl.program_id(1) * T
    acc = jnp.zeros((T * W, oc), jnp.float32)
    for dy in range(3):
        for dx in range(3):
            patch = xp_ref[pl.ds(r0 + dy, T), pl.ds(dx, W), :]          # (T, W, C) VMEM slice
            acc = acc + jnp.dot(patch.reshape(T * W, C), w_ref[dy * 3 + dx],
                                preferred_element_type=jnp.float32)
    y = jnp.maximum(acc + b_ref[...], 0.0)
    o_ref[...] = y.reshape(T, W, oc).astype(o_ref.dtype)


def conv3x3_bn_relu(p, w3, b3, *, row_cap=64):
    """relu(conv3x3(p, pad=1) @ folded-BN + b).  p:(N,H,W,C) NHWC, w3:(9,C,oc), b3:(oc,).

    In-kernel haloed conv: 9 shifted (T*W,C)x(C,oc) MXU matmuls accumulated in f32 — no
    im2col HBM materialization, only a +2 row/col zero halo pad.
    # TODO(synk): at production H the per-batch full-height input block should become a
    # manually DMA'd (T+2)-row halo slab (pl.ANY + make_async_copy) so VMEM stays bounded."""
    N, H, W, C = p.shape
    oc = w3.shape[-1]
    xp = jnp.pad(p, ((0, 0), (1, 1), (1, 1), (0, 0)))
    T = _pick_row_tile(H, row_cap)
    grid = (N, H // T)
    cost = pl.CostEstimate(
        flops=2 * N * H * W * 9 * C * oc, transcendentals=0,
        bytes_accessed=4 * (N * (H + 2) * (W + 2) * C + 9 * C * oc + N * H * W * oc))
    return pl.pallas_call(
        _conv3x3_kernel,
        out_shape=jax.ShapeDtypeStruct((N, H, W, oc), jnp.float32),
        grid=grid,
        in_specs=[pl.BlockSpec((None, H + 2, W + 2, C), lambda n, t: (n, 0, 0, 0)),
                  pl.BlockSpec((9, C, oc), lambda n, t: (0, 0, 0)),
                  pl.BlockSpec((1, oc), lambda n, t: (0, 0))],
        out_specs=pl.BlockSpec((None, T, W, oc), lambda n, t: (n, t, 0, 0)),
        compiler_params=_cparams(("parallel", "parallel")),
        cost_estimate=cost,
    )(xp, w3, b3.reshape(1, oc))


# --------------------------------------------------------------------------- bilinear upsample (align_corners=True), no HBM gathers

def _interp_taps(out_size, in_size):
    """2-tap (i0, i1, frac) per output position — matches torch Upsample(align_corners=True)."""
    if out_size == 1 or in_size == 1:
        z = np.zeros(out_size, np.int32)
        return z, z.copy(), np.zeros(out_size, np.float32)
    scale = (in_size - 1) / (out_size - 1)
    src = np.arange(out_size, dtype=np.float64) * scale
    i0 = np.clip(np.floor(src).astype(np.int32), 0, in_size - 1)
    i1 = np.minimum(i0 + 1, in_size - 1)
    frac = (src - i0).astype(np.float32)
    return i0, i1, frac


def _interp_matrix(out_size, in_size):
    i0, i1, frac = _interp_taps(out_size, in_size)
    A = np.zeros((out_size, in_size), np.float32)
    A[np.arange(out_size), i0] += 1.0 - frac
    A[np.arange(out_size), i1] += frac
    return A


def _tap_index_maps(hin, hout):
    # align_corners=True: src(r) = r*(hin-1)/(hout-1);  i0 = floor(src), i1 = min(i0+1, hin-1).
    def i0_map(n, r):
        return (n, (r * (hin - 1)) // (hout - 1), 0, 0)

    def i1_map(n, r):
        return (n, jnp.minimum((r * (hin - 1)) // (hout - 1) + 1, hin - 1), 0, 0)

    return i0_map, i1_map


def _hfrac(r, hin, hout):
    # In-kernel scalar H fraction (consistent with the integer i0 used by the index_maps).
    num = r * (hin - 1)
    i0 = num // (hout - 1)
    return num.astype(jnp.float32) / float(hout - 1) - i0.astype(jnp.float32)


def _ups_kernel(p0_ref, p1_ref, aw_ref, o_ref, *, hin, hout):
    fr = _hfrac(pl.program_id(1), hin, hout)
    xh = p0_ref[0].astype(jnp.float32) * (1.0 - fr) + p1_ref[0].astype(jnp.float32) * fr
    up = jnp.dot(aw_ref[...], xh, preferred_element_type=jnp.float32)        # (Wout, C)
    o_ref[...] = up[None].astype(o_ref.dtype)


def _ups_lateral_kernel(p0_ref, p1_ref, aw_ref, x_ref, w_ref, b_ref, o_ref, *, hin, hout):
    fr = _hfrac(pl.program_id(1), hin, hout)
    xh = p0_ref[0].astype(jnp.float32) * (1.0 - fr) + p1_ref[0].astype(jnp.float32) * fr
    up = jnp.dot(aw_ref[...], xh, preferred_element_type=jnp.float32)        # (Wout, C)
    lat = jnp.dot(x_ref[0], w_ref[...], preferred_element_type=jnp.float32) + b_ref[...]
    o_ref[...] = (up + jnp.maximum(lat, 0.0))[None].astype(o_ref.dtype)


def bilinear_upsample(p, Hout, Wout):
    """(N,Hin,Win,C) -> (N,Hout,Wout,C) bilinear, align_corners=True.

    Per output row, the two coarse tap rows are selected with data-dependent index_maps on
    the raw coarse map (no p0/p1 HBM gathers/temporaries); H blend on the VPU, W interp as
    one small (Wout,Win)x(Win,C) MXU matmul."""
    N, Hin, Win, C = p.shape
    aw = jnp.asarray(_interp_matrix(Wout, Win))
    i0_map, i1_map = _tap_index_maps(Hin, Hout)
    kernel = functools.partial(_ups_kernel, hin=Hin, hout=Hout)
    cost = pl.CostEstimate(
        flops=2 * N * Hout * Wout * Win * C + 3 * N * Hout * Win * C,
        transcendentals=0,
        bytes_accessed=4 * (2 * N * Hin * Win * C + Wout * Win + N * Hout * Wout * C))
    return pl.pallas_call(
        kernel,
        out_shape=jax.ShapeDtypeStruct((N, Hout, Wout, C), jnp.float32),
        grid=(N, Hout),
        in_specs=[pl.BlockSpec((None, 1, Win, C), i0_map),
                  pl.BlockSpec((None, 1, Win, C), i1_map),
                  pl.BlockSpec((Wout, Win), lambda n, r: (0, 0))],
        out_specs=pl.BlockSpec((None, 1, Wout, C), lambda n, r: (n, r, 0, 0)),
        compiler_params=_cparams(("parallel", "parallel")),
        cost_estimate=cost,
    )(p, p, aw)


def upsample2x_add_lateral(p, x, w1, b1):
    """out = bilinear_upsample_2x(p) + relu(x @ w1 + b1)  — 1x1 lateral conv fused in-kernel
    so the lateral feature map never round-trips through HBM."""
    N, Hin, Win, C = p.shape
    _, Hout, Wout, Cin = x.shape
    aw = jnp.asarray(_interp_matrix(Wout, Win))
    i0_map, i1_map = _tap_index_maps(Hin, Hout)
    kernel = functools.partial(_ups_lateral_kernel, hin=Hin, hout=Hout)
    cost = pl.CostEstimate(
        flops=2 * N * Hout * Wout * (Win * C + Cin * C) + 3 * N * Hout * Win * C,
        transcendentals=0,
        bytes_accessed=4 * (2 * N * Hin * Win * C + N * Hout * Wout * (Cin + C)
                            + Cin * C + Wout * Win + C))
    return pl.pallas_call(
        kernel,
        out_shape=jax.ShapeDtypeStruct((N, Hout, Wout, C), jnp.float32),
        grid=(N, Hout),
        in_specs=[pl.BlockSpec((None, 1, Win, C), i0_map),
                  pl.BlockSpec((None, 1, Win, C), i1_map),
                  pl.BlockSpec((Wout, Win), lambda n, r: (0, 0)),
                  pl.BlockSpec((None, 1, Wout, Cin), lambda n, r: (n, r, 0, 0)),
                  pl.BlockSpec((Cin, C), lambda n, r: (0, 0)),
                  pl.BlockSpec((1, C), lambda n, r: (0, 0))],
        out_specs=pl.BlockSpec((None, 1, Wout, C), lambda n, r: (n, r, 0, 0)),
        compiler_params=_cparams(("parallel", "parallel")),
        cost_estimate=cost,
    )(p, p, aw, x, w1, b1.reshape(1, C))


# --------------------------------------------------------------------------- FPN forward

def fpn_forward(xs_nchw, params):
    xs = [jnp.transpose(x, (0, 2, 3, 1)) for x in xs_nchw]      # NCHW -> NHWC (API boundary only)
    L = len(xs)

    # Coarsest lateral (nothing to fuse it with): row-tiled 1x1-conv+BN+ReLU matmul.
    wL, bL = params["in_branches"][-1]
    xt = xs[-1]
    N, H, W, Cin = xt.shape
    lat = matmul_bias_relu(xt.reshape(N * H * W, Cin), wL, bL).reshape(N, H, W, -1)

    # Top-down: p[i] = upsample2x(p[i+1]) + relu(conv1x1(x[i]))  — lateral fused in-kernel.
    ps = [None] * L
    ps[-1] = lat
    for i in range(L - 2, -1, -1):
        w1, b1 = params["in_branches"][i]
        ps[i] = upsample2x_add_lateral(ps[i + 1], xs[i], w1, b1)

    # Out branches: haloed 3x3 conv + BN + ReLU (Cout = oc, no lane padding), then upsample
    # the coarser levels to the finest resolution.
    H0, W0 = ps[0].shape[1], ps[0].shape[2]
    feats = []
    for p, (w3, b3) in zip(ps, params["out_branches"]):
        y = conv3x3_bn_relu(p, w3, b3)
        if y.shape[1] != H0 or y.shape[2] != W0:
            y = bilinear_upsample(y, H0, W0)
        feats.append(y)
    # TODO(synk): write each level straight into its channel slot of an NCHW concat buffer
    # (channel-slot out_spec + input_output_aliases) to drop this concat + transpose pass.
    out = jnp.concatenate(feats, axis=-1)
    return jnp.transpose(out, (0, 3, 1, 2))                     # back to NCHW


# --------------------------------------------------------------------------- params (BN folded; mid channels lane-padded, out channels NOT padded)

def init_params(key, in_channels, out_channels, eps=1e-5):
    n_lvl = len(in_channels)
    out_chans = out_channels // n_lvl
    cmid = max(LANE, _round_up(out_channels, LANE))   # lane-dense mid channels (zero padding
    params = {"in_branches": [], "out_branches": [], "out_chans": out_chans}
    # NOTE: padded weight columns AND padded bias entries must stay zero — ReLU keeps the
    # padded channels exactly 0 through the whole pyramid, which makes the padding exact.

    for cin in in_channels:
        key, k1, k2, k3, k4, k5 = jax.random.split(key, 6)
        w = jax.random.normal(k1, (out_channels, cin), jnp.float32) / np.sqrt(cin)
        gamma = 1.0 + 0.1 * jax.random.normal(k2, (out_channels,), jnp.float32)
        beta = 0.1 * jax.random.normal(k3, (out_channels,), jnp.float32)
        mean = 0.1 * jax.random.normal(k4, (out_channels,), jnp.float32)
        var = jax.random.uniform(k5, (out_channels,), jnp.float32, minval=0.5, maxval=1.5)
        scale = gamma / jnp.sqrt(var + eps)
        w_mat = jnp.transpose(w) * scale[None, :]                      # (Cin, out_channels)
        bias = beta - mean * scale
        w_mat = jnp.pad(w_mat, ((0, 0), (0, cmid - out_channels)))
        bias = jnp.pad(bias, (0, cmid - out_channels))
        params["in_branches"].append((w_mat, bias))

    for _ in in_channels:
        key, k1, k2, k3, k4, k5 = jax.random.split(key, 6)
        w = jax.random.normal(k1, (out_chans, out_channels, 3, 3), jnp.float32) / np.sqrt(9 * out_channels)
        gamma = 1.0 + 0.1 * jax.random.normal(k2, (out_chans,), jnp.float32)
        beta = 0.1 * jax.random.normal(k3, (out_chans,), jnp.float32)
        mean = 0.1 * jax.random.normal(k4, (out_chans,), jnp.float32)
        var = jax.random.uniform(k5, (out_chans,), jnp.float32, minval=0.5, maxval=1.5)
        scale = gamma / jnp.sqrt(var + eps)
        w_hwio = jnp.transpose(w, (2, 3, 1, 0)) * scale[None, None, None, :]   # (3,3,Cin,oc)
        bias = beta - mean * scale
        w_hwio = jnp.pad(w_hwio, ((0, 0), (0, 0), (0, cmid - out_channels), (0, 0)))
        w_taps = w_hwio.reshape(9, cmid, out_chans)     # tap order (ky,kx) matches the kernel loop
        params["out_branches"].append((w_taps, bias))

    return params


# --------------------------------------------------------------------------- pure-XLA reference (logic self-check)

def _upsample_ref(x, Hout, Wout):
    N, Hin, Win, C = x.shape
    i0h, i1h, fh = _interp_taps(Hout, Hin)
    i0w, i1w, fw = _interp_taps(Wout, Win)
    xh = (x[:, i0h] * (1.0 - fh)[None, :, None, None]
          + x[:, i1h] * fh[None, :, None, None])
    return (xh[:, :, i0w] * (1.0 - fw)[None, None, :, None]
            + xh[:, :, i1w] * fw[None, None, :, None])


def fpn_reference(xs_nchw, params):
    xs = [jnp.transpose(x, (0, 2, 3, 1)) for x in xs_nchw]
    lats = []
    for x, (w1, b1) in zip(xs, params["in_branches"]):
        N, H, W, Cin = x.shape
        y = jnp.maximum(jnp.dot(x.reshape(N * H * W, Cin), w1,
                                precision=lax.Precision.HIGHEST) + b1, 0.0)
        lats.append(y.reshape(N, H, W, -1))
    ps = [None] * len(lats)
    ps[-1] = lats[-1]
    for i in range(len(lats) - 2, -1, -1):
        ps[i] = _upsample_ref(ps[i + 1], lats[i].shape[1], lats[i].shape[2]) + lats[i]
    H0, W0 = ps[0].shape[1], ps[0].shape[2]
    feats = []
    for p, (w3, b3) in zip(ps, params["out_branches"]):
        C = p.shape[-1]
        w = w3.reshape(3, 3, C, -1)
        y = lax.conv_general_dilated(p, w, (1, 1), ((1, 1), (1, 1)),
                                     dimension_numbers=("NHWC", "HWIO", "NHWC"),
                                     precision=lax.Precision.HIGHEST)
        y = jnp.maximum(y + b3, 0.0)
        if y.shape[1] != H0 or y.shape[2] != W0:
            y = _upsample_ref(y, H0, W0)
        feats.append(y)
    return jnp.transpose(jnp.concatenate(feats, axis=-1), (0, 3, 1, 2))


# --------------------------------------------------------------------------- main

if __name__ == "__main__":
    in_channels = [16, 32, 64]
    out_channels = 48
    N, H0 = 2, 16

    key = jax.random.PRNGKey(0)
    key, *ks = jax.random.split(key, 1 + len(in_channels))
    # NCHW inputs, each pyramid level halves the spatial resolution.
    xs = [
        jax.random.normal(k, (N, c, H0 // (2 ** i), H0 // (2 ** i)), jnp.float32)
        for i, (k, c) in enumerate(zip(ks, in_channels))
    ]

    params = init_params(jax.random.PRNGKey(1), in_channels, out_channels)

    out = jax.block_until_ready(fpn_forward(xs, params))

    expected_c = (out_channels // len(in_channels)) * len(in_channels)
    assert out.shape == (N, expected_c, H0, H0), out.shape
    assert bool(jnp.all(jnp.isfinite(out)))

    # Logic self-check vs a plain-XLA reference (loose tolerance: only meant to catch
    # indexing/ordering bugs, not MXU-vs-XLA f32 rounding differences).
    ref = jax.block_until_ready(fpn_reference(xs, params))
    max_err = float(jnp.max(jnp.abs(out - ref)))
    assert max_err < 1e-1, max_err

    print("KERNEL_OK")
</pallas_src>

<mosaic_0001>
module attributes {stable_mosaic.version = 11 : i64} {
  func.func @_mm_bias_relu_kernel(%arg0: i32, %arg1: memref<16x64xf32, #tpu.memory_space<vmem>>, %arg2: memref<64x128xf32, #tpu.memory_space<vmem>>, %arg3: memref<1x128xf32, #tpu.memory_space<vmem>>, %arg4: memref<16x128xf32, #tpu.memory_space<vmem>>) attributes {dimension_semantics = [#tpu.dimension_semantics<parallel>], iteration_bounds = array<i64: 2>, scalar_prefetch = 0 : i64, scratch_operands = 0 : i64, tpu.core_type = #tpu.core_type<tc>, window_params = [{transform_indices = @transform_0, window_bounds = array<i64: 16, 64>}, {pipeline_mode = #tpu.pipeline_mode<synchronous>, transform_indices = @transform_1, window_bounds = array<i64: 64, 128>}, {pipeline_mode = #tpu.pipeline_mode<synchronous>, transform_indices = @transform_2, window_bounds = array<i64: 1, 128>}, {transform_indices = @transform_3, window_bounds = array<i64: 16, 128>}]} {
    %c0 = arith.constant 0 : index
    %c0_0 = arith.constant 0 : index
    %0 = vector.load %arg1[%c0, %c0_0] : memref<16x64xf32, #tpu.memory_space<vmem>>, vector<16x64xf32>
    %c0_1 = arith.constant 0 : index
    %c0_2 = arith.constant 0 : index
    %1 = vector.load %arg2[%c0_1, %c0_2] : memref<64x128xf32, #tpu.memory_space<vmem>>, vector<64x128xf32>
    %cst = arith.constant dense<0.000000e+00> : vector<16x128xf32>
    %2 = tpu.matmul %0, %1, %cst {dimension_numbers = #tpu.dot_dimension_numbers<[1], [0], [0], [1], [0, 0, 1, 1], [], []>} : vector<16x64xf32>, vector<64x128xf32>, vector<16x128xf32> -> vector<16x128xf32>
    %c0_3 = arith.constant 0 : index
    %c0_4 = arith.constant 0 : index
    %3 = vector.load %arg3[%c0_3, %c0_4] : memref<1x128xf32, #tpu.memory_space<vmem>>, vector<1x128xf32>
    %4 = vector.broadcast %3 : vector<1x128xf32> to vector<16x128xf32>
    %5 = arith.addf %2, %4 : vector<16x128xf32>
    %cst_5 = arith.constant 0.000000e+00 : f32
    %6 = vector.broadcast %cst_5 : f32 to vector<16x128xf32>
    %7 = arith.maximumf %5, %6 : vector<16x128xf32>
    %c0_6 = arith.constant 0 : index
    %c0_7 = arith.constant 0 : index
    %8 = vector.load %arg4[%c0_6, %c0_7] : memref<16x128xf32, #tpu.memory_space<vmem>>, vector<16x128xf32>
    tpu.vector_store %arg4[%c0_6, %c0_7], %7 {strides = array<i32>} : memref<16x128xf32, #tpu.memory_space<vmem>>, vector<16x128xf32>,
    return
  }
  func.func @transform_0(%arg0: i32) -> (i32, i32) {
    %c0_i32 = arith.constant 0 : i32
    %c0_i32_0 = arith.constant 0 : i32
    return %arg0, %c0_i32 : i32, i32
  }
  func.func @transform_1(%arg0: i32) -> (i32, i32) {
    %c0_i32 = arith.constant 0 : i32
    %c0_i32_0 = arith.constant 0 : i32
    %c0_i32_1 = arith.constant 0 : i32
    return %c0_i32, %c0_i32_0 : i32, i32
  }
  func.func @transform_2(%arg0: i32) -> (i32, i32) {
    %c0_i32 = arith.constant 0 : i32
    %c0_i32_0 = arith.constant 0 : i32
    %c0_i32_1 = arith.constant 0 : i32
    return %c0_i32, %c0_i32_0 : i32, i32
  }
  func.func @transform_3(%arg0: i32) -> (i32, i32) {
    %c0_i32 = arith.constant 0 : i32
    %c0_i32_0 = arith.constant 0 : i32
    return %arg0, %c0_i32 : i32, i32
  }
}

</mosaic_0001>

<bundles_post_ra>
// kernel: tpu_custom_call.1
= control target key start
LH: loop header
LB: loop body
LE: loop exit
PB: predicated region body
PF: predicated region fallthrough
CT: control target
= control target key end

     0   :  { %8 = vsyncpa [#allocation3], 0  ;;  %s906_s0 = inlined_call_operand.hbm [shape: f32[32,64], index: 0, kind: input, shape index: {}]   ;;  %s907_s1 = inlined_call_operand.hbm [shape: f32[64,128], index: 1, kind: input, shape index: {}]   ;;  %s908_s2 = inlined_call_operand.vmem [shape: f32[1,128], index: 2, kind: input, shape index: {}]   ;;  %s909_s3 = inlined_call_operand.hbm [shape: f32[32,128], index: 3, kind: output, shape index: {}]  }
   0x1   :  { %10 = vsyncpa [#allocation3 + $0x1], 0 }
   0x2   :  { %11 = vsyncpa [#allocation6], 0 }
   0x3   :  { %12 = vsyncpa [#allocation4], 0 }
   0x4   :  { %14 = vsyncpa [#allocation4 + $0x1], 0  ;;  %s690_s12 = smov 0   ;;  %s692_s13 = smov 0  }
   0x5   :  { %s694_s14 = smov 0   ;;  %s696_s15 = smov 0  }
   0x6 LB: > { %s711_s16 = sadd.s32 4294967295, %s661_s15   ;;  %s406_s17 = sadd.s32 4294967294, %s661_s15   ;;  %s661_s15 = sphi %s696_s15, %s929_s15   ;;  %s657_s14 = sphi %s694_s14, %s928_s14   ;;  %s653_s13 = sphi %s692_s13, %s927_s13   ;;  %s649_s12 = sphi %s690_s12, %s926_s12  }
   0x7   : > { %p40_p0 = scmp.ne.s32.totalorder %s653_s13, %s649_s12  ;;  %p910_p1 = scmp.eq.s32.totalorder %s711_s16, 0 }
   0x8   : > { %p112_p3 = scmp.eq.s32.totalorder %s406_s17, 1  ;;  %p407_p5 = scmp.ge.s32.totalorder %s661_s15, 1 }
   0x9   : > { %p720_p4 = por %p910_p1, %p40_p0  ;;  %p119_p7 = scmp.lt.s32.totalorder %s661_s15, 3 }
   0xa   : > { %p725_p6 = por %p112_p3, %p40_p0  ;;  %s663_s21 = smov [#allocation5]  }
   0xb   : > { %s913_s18 = scalar_select %p720_p4, 1, 0 }
   0xc   : > { %s914_s19 = scalar_select %p725_p6, 1, 0 }
   0xd   : > { %p730_p8 = pnand %p407_p5, %p119_p7  ;;  %s131_s22 = sshll.u32 %s663_s21, 4  ;;  %s734_s22 = int_to_ptr.vmem [resolvable:$true] %s131_s22 }
   0xe   : > { %s746_s24 = sadd.s32 1, %s661_s15   ;;  %s27_s25 = sadd.s32 1, %s657_s14 }
   0xf   : > { %s915_s20 = scalar_select %p730_p8, 1, 0 }
  0x10   : > { %p480_p9 = pneg %p730_p8  ;;  %s24_s26 = ssub.s32 %s661_s15, %s746_s24 }
  0x11   : > { %s533_s29 = scalar_lea.hbm %s907_s1, 1024 }
  0x12   : > { %p741_p11 = pnand %p480_p9, %p910_p1  ;;  %p534_p12 = scmp.ne.s32.totalorder %s907_s1, %s533_s29 }
  0x13   : > { %p540_p5 = scmp.lt.u32.totalorder %s533_s29, %s907_s1 }
  0x14   : > { %p535_p13 = pneg %p741_p11 }
  0x16   : > { %p536_p0 = pnand %p535_p13, %p534_p12 }
  0x18   : > { %p537_p3 = pneg %p536_p0 }
  0x1a   : > { %p542_p7 = pnand %p540_p5, %p537_p3 }
  0x1c   : > { %545 = shalt.err (!%p542_p7)
}
  0x1d   : > { %s546_s7 = scalar_lea.vmem %s734_s22, 1024  ;;  %p554_p2 = scmp.lt.s32.totalorder %s734_s22, %s734_s22 }
  0x1e   : > { %p547_p9 = scmp.ne.s32.totalorder %s734_s22, %s546_s7  ;;  %p555_p6 = scmp.lt.s32.totalorder %s546_s7, %s546_s7 }
  0x20   : > { %p549_p10 = pnand %p547_p9, %p535_p13  ;;  %p556_p4 = por %p555_p6, %p554_p2 }
  0x22   : > { %p550_p1 = pneg %p549_p10 }
  0x24   : > { %p557_p8 = pnand %p556_p4, %p550_p1 }
  0x26   : > { %560 = shalt.err (!%p557_p8)
}
  0x27   : > { %s664_s8 = smov 128   ;;  %s665_s9 = smov 8  }
  0x28   : > { %483 = dma.hbm_to_vmem [thread:$0]  (!%p741_p11), %s907_s1, 1024, %s734_s22, [#allocation6], %s664_s8, %s664_s8, %s665_s9  }
  0x29   : > { %p25_p1 = scmp.eq.s32.totalorder %s24_s26, 0  ;;  %p34_p2 = scmp.ne.s32.totalorder %s657_s14, %s653_s13 }
  0x2a   : > { %p35_p4 = scmp.eq.s32.totalorder %s661_s15, 0  ;;  %p493_p6 = scmp.lt.s32.totalorder %s661_s15, 2 }
  0x2b   : > { %s780_s17 = scalar_select %p25_p1, %s657_s14, %s27_s25  }
  0x2c   : > { %p36_p8 = por %p35_p4, %p34_p2  ;;  %p917_p10 = scmp.eq.s32.totalorder %s711_s16, 1 }
  0x2d   : > { %s148_s23 = sand.u32 1, %s657_s14   ;;  %s425_s27 = sshll.u32 %s661_s15, 8 }
  0x2e   : > { %p784_p12 = por %p917_p10, %p34_p2  ;;  %s410_s28 = sshll.u32 %s148_s23, 4 }
  0x2f   : > { %s793_s4 = scalar_lea.hbm %s906_s0, %s425_s27  ;;  %s152_s22 = scalar_lea.vmem [#allocation2], %s410_s28 }
  0x30   : > { %s159_s25 = sshll.u32 %s152_s22, 4  ;;  %p795_p11 = pnand %p493_p6, %p36_p8  ;;  %s799_s25 = int_to_ptr.vmem [resolvable:$true] %s159_s25 }
  0x31   : > { %s801_s5 = scalar_lea.sflag [#allocation3], %s148_s23  ;;  %s561_s6 = scalar_lea.hbm %s793_s4, 256 }
  0x32   : > { %p562_p13 = scmp.ne.s32.totalorder %s793_s4, %s561_s6  ;;  %p563_p0 = pneg %p795_p11 }
  0x33   : > { %s566_s11 = scalar_lea.hbm %s906_s0, 512  ;;  %p567_p7 = scmp.lt.u32.totalorder %s793_s4, %s906_s0 }
  0x34   : > { %p564_p3 = pnand %p563_p0, %p562_p13  ;;  %p568_p9 = scmp.lt.u32.totalorder %s566_s11, %s561_s6 }
  0x35   : > { %p570_p2 = scmp.lt.u32.totalorder %s561_s6, %s793_s4 }
  0x36   : > { %p565_p5 = pneg %p564_p3  ;;  %p569_p1 = por %p568_p9, %p567_p7 }
  0x38   : > { %p571_p4 = por %p570_p2, %p569_p1 }
  0x3a   : > { %p572_p6 = pnand %p571_p4, %p565_p5 }
  0x3c   : > { %575 = shalt.err (!%p572_p6)
}
  0x3d   : > { %s576_s23 = scalar_lea.vmem %s799_s25, 256  ;;  %s666_s29 = smov [#allocation2]  }
  0x3e   : > { %p577_p8 = scmp.ne.s32.totalorder %s799_s25, %s576_s23  ;;  %s581_s30 = sshll.u32 %s666_s29, 4  ;;  %s582_s30 = int_to_ptr.vmem [resolvable:$false] %s581_s30 }
  0x3f   : > { %s583_s22 = scalar_lea.vmem %s582_s30, 512  ;;  %p584_p3 = scmp.lt.s32.totalorder %s799_s25, %s582_s30 }
  0x40   : > { %p579_p10 = pnand %p577_p8, %p563_p0  ;;  %p585_p7 = scmp.lt.s32.totalorder %s583_s22, %s576_s23 }
  0x42   : > { %p580_p13 = pneg %p579_p10  ;;  %p586_p9 = por %p585_p7, %p584_p3 }
  0x44   : > { %p587_p1 = pnand %p586_p9, %p580_p13 }
  0x46   : > { %590 = shalt.err (!%p587_p1)
}
  0x47   : > { %487 = dma.hbm_to_vmem [thread:$0]  (!%p795_p11), %s793_s4, 256, %s799_s25, %s801_s5, %s664_s8, %s664_s8, %s665_s9  }
  0x48   : > { %p920_p0 = scmp.ne.s32.totalorder %s915_s20, 0 }
  0x49   : > { %s835_s6 = sand.u32 (!%p920_p0), 1, %s653_s13   ;;  %p921_p5 = scmp.ne.s32.totalorder (!%p920_p0), %s913_s18, 0 }
  0x4a   : > { %171 = sbr.rel (%p920_p0) target bundleno = 336 (0x150), region = 32  ;;  %s414_s7 = sshll.u32 (!%p920_p0), %s835_s6, 4 }
  0x4b   : > { %s174_s10 = scalar_lea.sflag (!%p920_p0), [#allocation3], %s835_s6  ;;  %s177_s26 = scalar_lea.vmem (!%p920_p0), [#allocation2], %s414_s7 }
  0x51   : > { %636 = dma.done.wait (%p921_p5), %s174_s10, 256  }
  0x52   : > { %638 = vsyncadd (%p921_p5), %s174_s10, 4294967040  ;;  %p922_p11 = scmp.eq.s32.totalorder %s711_s16, 0 }
  0x54   : > { %640 = dma.done.wait (%p922_p11), [#allocation6], 1024   ;;  %p923_p2 = pmov %p922_p11 }
  0x55   : > { %v208_v0 = vld [vmem:[#allocation5] sm:$0xff]  ;;  %v209_v1 = vld [vmem:[#allocation5 + $0x8] sm:$0xff]  ;;  %v210_v2 = vld [vmem:[#allocation5 + $0x10] sm:$0xff]  ;;  %vm223_vm0 = vcmask 523264   ;;  %s203_s8 = scalar_lea.vmem [#allocation7], %s414_s7  ;;  %s426_s4 = sshll.u32 %s711_s16, 8 }
  0x56   : > { %642 = vsyncadd (%p923_p2), [#allocation6], 4294966272  ;;  %v456_v3 = vpack.c.bf16 %v209_v1, %v208_v0  ;;  %v211_v4 = vld [vmem:[#allocation5 + $0x18] sm:$0xff]  ;;  %v212_v6 = vld [vmem:[#allocation5 + $0x20] sm:$0xff]  ;;  %s323_s9 = sshll.u32 %s203_s8, 4  ;;  %s862_s11 = scalar_lea.hbm %s909_s3, %s426_s4  ;;  %s857_s9 = int_to_ptr.vmem [resolvable:$true] %s323_s9 }
  0x57   : > { %v460_v5 = vpack.c.bf16 %v211_v4, %v210_v2  ;;  %v213_v7 = vld [vmem:[#allocation5 + $0x28] sm:$0xff]  ;;  %v206_v8 = vld [vmem:[%s177_s26] sm:$0xff]  ;;  %v215_v11 = vld [vmem:[#allocation5 + $0x38] sm:$0xff]  ;;  %s310_s27 = scalar_lea.sflag [#allocation4], %s835_s6  ;;  %s591_s28 = scalar_lea.vmem %s857_s9, 256 }
  0x58   : > { %457 = vmatprep.subr.bf16.mxu0 %v456_v3  ;;  %453 = vmatprep.mubr.msk.f32.mxu0 %vm223_vm0, %v206_v8  ;;  %v464_v9 = vpack.c.bf16 %v213_v7, %v212_v6  ;;  %v214_v10 = vld [vmem:[#allocation5 + $0x30] sm:$0xff]  ;;  %v207_v13 = vld [vmem:[%s177_s26 + $0x8] sm:$0xff]  ;;  %v417_v14 = vld [vmem:[%s908_s2] ss:$0 sm:$0xff]  ;;  %p592_p4 = scmp.ne.s32.totalorder %s857_s9, %s591_s28  ;;  %s667_s16 = smov [#allocation7]  }
  0x59   : > { %459 = vmatpush3.bf16.msra.mxu0 %v456_v3  ;;  %v468_v12 = vpack.c.bf16 %v215_v11, %v214_v10  ;;  %s595_s23 = sshll.u32 %s667_s16, 4  ;;  %s596_s23 = int_to_ptr.vmem [resolvable:$false] %s595_s23 }
  0x5a   : > { %461 = vmatprep.subr.bf16.mxu0 %v460_v5  ;;  %p593_p6 = pnand %p592_p4, %p784_p12  ;;  %s597_s29 = scalar_lea.vmem %s596_s23, 512 }
  0x5b   : > { %p598_p10 = scmp.lt.s32.totalorder %s857_s9, %s596_s23  ;;  %p599_p13 = scmp.lt.s32.totalorder %s597_s29, %s591_s28 }
  0x5c   : > { %p594_p8 = pneg %p593_p6 }
  0x5d   : > { %463 = vmatpush3.bf16.msra.mxu0 %v460_v5  ;;  %p600_p3 = por %p599_p13, %p598_p10 }
  0x5e   : > { %465 = vmatprep.subr.bf16.mxu0 %v464_v9 }
  0x5f   : > { %p601_p7 = pnand %p600_p3, %p594_p8 }
  0x61   : > { %467 = vmatpush3.bf16.msra.mxu0 %v464_v9 }
  0x62   : > { %469 = vmatprep.subr.bf16.mxu0 %v468_v12 }
  0x65   : > { %471 = vmatpush3.bf16.msra.mxu0 %v468_v12 }
  0x68   : > { %454 = vmatmul.mubr.msk.f32.vlgmr.msra.gmra.mrb[0].mxu0 %vm223_vm0, %v207_v13 }
 0x13b   : > { %v455_v15 = vpop.f32.mrb[0].mxu0 }
 0x13c   : > { %v302_v16 = vadd.f32 %v455_v15, %v417_v14  ;;  %v296_v17 = vpop.f32.mrb[1].mxu0 }
 0x13d   : > { %v297_v18 = vadd.f32 %v417_v14, %v296_v17 }
 0x13e   : > { %v306_v19 = vmax.f32 %v302_v16, 0.0 }
 0x13f   : > { %v305_v20 = vmax.f32 %v297_v18, 0.0 }
 0x140   : > { %308 = vst [vmem:[%s203_s8 + $0x8] sm:$0xff] %v306_v19 }
 0x141   : > { %307 = vst [vmem:[%s203_s8] sm:$0xff] %v305_v20 }
 0x142   : > { %604 = shalt.err (!%p601_p7)
}
 0x143   : > { %s605_s30 = scalar_lea.hbm %s862_s11, 256  ;;  %s609_s10 = scalar_lea.hbm %s909_s3, 512 }
 0x144   : > { %p606_p9 = scmp.ne.s32.totalorder %s862_s11, %s605_s30  ;;  %p610_p5 = scmp.lt.u32.totalorder %s862_s11, %s909_s3 }
 0x145   : > { %p611_p11 = scmp.lt.u32.totalorder %s609_s10, %s605_s30  ;;  %p613_p4 = scmp.lt.u32.totalorder %s605_s30, %s862_s11 }
 0x146   : > { %p607_p1 = pnand %p606_p9, %p784_p12 }
 0x147   : > { %p612_p2 = por %p611_p11, %p610_p5 }
 0x148   : > { %p608_p0 = pneg %p607_p1 }
 0x149   : > { %p614_p6 = por %p613_p4, %p612_p2 }
 0x14b   : > { %p615_p8 = pnand %p614_p6, %p608_p0 }
 0x14d   : > { %618 = shalt.err (!%p615_p8)
}
 0x14e   : > { %s668_s20 = smov 128   ;;  %s669_s8 = smov 8  }
 0x14f   : > { %478 = dma.vmem_to_hbm [thread:$0]  (%p784_p12), %s857_s9, 256, %s862_s11, %s310_s27, %s668_s20, %s668_s20, %s669_s8  }
 0x150 PF: > { %s338_s4 = sand.u32 1, %s649_s12   ;;  %p924_p10 = scmp.ne.s32.totalorder %s914_s19, 0 }
 0x151   : > { %p925_p13 = scmp.ge.s32.totalorder %s661_s15, 2  ;;  %s339_s25 = scalar_lea.sflag [#allocation4], %s338_s4 }
 0x153   : > { %p489_p3 = pnand %p925_p13, %p924_p10 }
 0x155   : > { %644 = dma.done.wait (!%p489_p3), %s339_s25, 256  }
 0x156   : > { %646 = vsyncadd (!%p489_p3), %s339_s25, 4294967040  ;;  %p17_p7 = scmp.ge.s32.totalorder %s746_s24, 4   ;;  %s926_s12 = smov %s653_s13 }
 0x157   : > { %s927_s13 = smov %s657_s14  ;;  %s928_s14 = smov %s780_s17 }
 0x158   : > { %s929_s15 = smov %s746_s24  ;;  %19 = sbr.rel (!%p17_p7) target bundleno = 6 (0x6), region = 81 }
 0x15f   :  { %344 = vsyncpa [#allocation3], 1 }
 0x160   :  { %346 = vsyncpa [#allocation3 + $0x1], 1 }
 0x161   :  { %347 = vsyncpa [#allocation6], 1 }
 0x162   :  { %348 = vsyncpa [#allocation4], 1 }
 0x163   :  { %350 = vsyncpa [#allocation4 + $0x1], 1 }

</bundles_post_ra>
